<compile_context>
chip_gen: v7x
topology: tpu7x:2x2x1
jax: 0.10.0
libtpu: 0.0.40
codegen_flags: <defaults>
</compile_context>

<pallas_src>
import functools

import jax
import jax.numpy as jnp
from jax import lax
from jax.experimental import pallas as pl
from jax.experimental.pallas import tpu as pltpu


def _round_up(n, m):
    return ((n + m - 1) // m) * m


def _pick_tile(n_pad, cap):
    """Largest multiple of 128 that divides n_pad and is <= cap (n_pad % 128 == 0)."""
    t = max(128, min(cap, n_pad))
    t -= t % 128
    while t > 128 and n_pad % t != 0:
        t -= 128
    return max(t, 128)


# ---------------------------------------------------------------------------
# Kernel 1: fused 1x1 Conv3d projections (runs once per spatial position).
#   q = Wq x + bq   (P, TN)      k = Wk x + bk   (P, TN)      v = Wv x + bv (C, TN)
# Hoisting these out of the attention KV loop removes the dominant redundant
# MXU work (the C x C value projection) and shrinks the streamed K tensor.
# ---------------------------------------------------------------------------
def _pam_proj_kernel(x_ref, wq_ref, bq_ref, wk_ref, bk_ref, wv_ref, bv_ref,
                     q_ref, k_ref, v_ref):
    x = x_ref[0]                                                     # (C, TN)
    q = jnp.dot(wq_ref[...], x, preferred_element_type=jnp.float32) + bq_ref[...]
    k = jnp.dot(wk_ref[...], x, preferred_element_type=jnp.float32) + bk_ref[...]
    v = jnp.dot(wv_ref[...], x, preferred_element_type=jnp.float32) + bv_ref[...]
    q_ref[0] = q.astype(q_ref.dtype)
    k_ref[0] = k.astype(k_ref.dtype)
    v_ref[0] = v.astype(v_ref.dtype)


# ---------------------------------------------------------------------------
# Kernel 2: flash attention over the spatial axis + gamma * out + x residual.
# Grid (B, N//TQ, N//TK); online softmax; O(TQ*TK + C*TQ) VMEM.
# ---------------------------------------------------------------------------
def _pam_attn_kernel(q_ref, k_ref, v_ref, x_ref, gamma_ref, out_ref,
                     m_sc, l_sc, acc_sc, *, n_valid, needs_mask, exp_dtype):
    """In-kernel shapes:
      q_ref (1, P, TQ)   k_ref (1, P, TK)   v_ref (1, C, TK)   x_ref (1, C, TQ)
      m_sc / l_sc (1, TQ) f32               acc_sc (C, TQ) f32
    """
    ki = pl.program_id(2)

    @pl.when(ki == 0)
    def _init():
        # Large finite negative (not -inf): safe even when key masking is active.
        m_sc[...] = jnp.full_like(m_sc, -1e30)
        l_sc[...] = jnp.zeros_like(l_sc)
        acc_sc[...] = jnp.zeros_like(acc_sc)

    q = q_ref[0]                                                     # (P, TQ)
    k = k_ref[0]                                                     # (P, TK)
    v = v_ref[0]                                                     # (C, TK)

    # s[j, i] = sum_c k[c, j] * q[c, i]  (== energy[i, j]); contraction over the
    # (padded) projected channel dim of both operands -- no k.T materialized.
    s = lax.dot_general(k, q, dimension_numbers=(((0,), (0,)), ((), ())),
                        preferred_element_type=jnp.float32)          # (TK, TQ)

    if needs_mask:
        # Only the last KV tile contains padded key columns (padding < 128 <= TK),
        # but the compare+select is cheap VPU filler; masked p underflows to 0.
        tk = s.shape[0]
        key_pos = ki * tk + lax.broadcasted_iota(jnp.int32, s.shape, 0)
        s = jnp.where(key_pos < n_valid, s, -1e30)

    # Online softmax over the key axis (axis 0).
    m_prev = m_sc[...]
    m_new = jnp.maximum(m_prev, jnp.max(s, axis=0, keepdims=True))   # (1, TQ)
    alpha = jnp.exp(m_prev - m_new)
    # bf16 exp on bf16-capable chips (EUP is the saturating slot at small C);
    # f32 path stays exact.  Numerator and denominator use the same rounded p.
    p = jnp.exp((s - m_new).astype(exp_dtype))                       # (TK, TQ)
    l_sc[...] = alpha * l_sc[...] + jnp.sum(p.astype(jnp.float32),
                                            axis=0, keepdims=True)
    acc_sc[...] = alpha * acc_sc[...] + jnp.dot(
        v, p.astype(v.dtype), preferred_element_type=jnp.float32)    # (C, TQ)
    m_sc[...] = m_new

    @pl.when(ki == pl.num_programs(2) - 1)
    def _finalize():
        attn_out = acc_sc[...] * pl.reciprocal(l_sc[...], approx=False)
        gamma = gamma_ref[0]
        out_ref[0] = (gamma * attn_out
                      + x_ref[0].astype(jnp.float32)).astype(out_ref.dtype)


def _attn_vmem_budget(C, P, tq, tk, cdb, xdb):
    blocks = 2 * (P * tq + P * tk) * cdb          # Q / K streams (double-buffered)
    blocks += 2 * C * tk * cdb                    # V stream
    blocks += 2 * C * tq * xdb                    # x (residual)
    blocks += 2 * C * tq * xdb                    # out
    scratch = (2 * tq + C * tq) * 4
    temps = 4 * tq * tk * 4                       # s / p / mask temporaries headroom
    return blocks + scratch + temps


def _proj_vmem_budget(C, P, tn, cdb, xdb):
    blocks = 2 * C * tn * xdb                     # x in
    blocks += 2 * (2 * P * tn + C * tn) * cdb     # q / k / v out
    weights = 2 * ((2 * P * C + C * C) * cdb + (2 * P + C) * 4)
    temps = 3 * C * tn * 4
    return blocks + weights + temps


def _vmem_limit(budget_bytes):
    # Explicit limit: generous on v5e/v6e, never above v7x's 64 MiB physical.
    return int(min(64 << 20, max(32 << 20, budget_bytes * 5 // 4 + (4 << 20))))


def pam_forward(x, params, *, tq=None, tk=None, compute_dtype=None):
    """x: (B, C, H, W, Z).  Returns the PAM output, same shape/dtype as x."""
    B, C, H, W, Z = x.shape
    N = H * W * Z
    in_dt = x.dtype
    cdt = jnp.dtype(compute_dtype) if compute_dtype is not None else jnp.dtype(in_dt)
    f32 = jnp.float32
    Cq = params["wq"].shape[0]
    P = max(8, _round_up(Cq, 8))                  # sublane-aligned q/k channels
    pad_c = P - Cq

    # Pad the spatial axis to a multiple of 128; padded keys are masked in the
    # softmax, padded queries are sliced off the output.
    n_pad = _round_up(N, 128)

    cap_q = 512                                   # VMEM-safe on v7x at C<=1024
    cap_k = 512
    if B == 1 and n_pad >= 256:
        cap_q = min(cap_q, n_pad // 2)            # keep >= 2 parallel query tiles (v7x 2 TCs)
    tq = _pick_tile(n_pad, cap_q) if tq is None else tq
    tk = _pick_tile(n_pad, cap_k) if tk is None else tk
    assert n_pad % tq == 0 and n_pad % tk == 0, "tile sizes must divide padded N"

    # (B, C, N) layout: channels on sublanes, spatial positions on lanes -> no
    # transposes, lane-dense tiles even for small channel counts.
    x_flat = x.reshape(B, C, N)
    if n_pad != N:
        x_flat = jnp.pad(x_flat, ((0, 0), (0, 0), (0, n_pad - N)))

    # 1x1 Conv3d weights.  Zero-padding the q/k output channels (and biases)
    # leaves the energy matrix numerically unchanged.
    wq = jnp.pad(params["wq"], ((0, pad_c), (0, 0))).astype(cdt)     # (P, C)
    wk = jnp.pad(params["wk"], ((0, pad_c), (0, 0))).astype(cdt)     # (P, C)
    bq = jnp.pad(params["bq"], (0, pad_c)).astype(f32).reshape(P, 1)
    bk = jnp.pad(params["bk"], (0, pad_c)).astype(f32).reshape(P, 1)
    wv = params["wv"].astype(cdt)                                    # (C, C)
    bv = params["bv"].astype(f32).reshape(C, 1)
    gamma = params["gamma"].astype(f32).reshape(1)

    cdb = jnp.dtype(cdt).itemsize
    xdb = jnp.dtype(in_dt).itemsize

    # ---- projection pass (once per position) ------------------------------
    tn = tk
    const2 = lambda shape: pl.BlockSpec(shape, lambda b, i: (0,) * len(shape))
    q_all, k_all, v_all = pl.pallas_call(
        _pam_proj_kernel,
        out_shape=(jax.ShapeDtypeStruct((B, P, n_pad), cdt),
                   jax.ShapeDtypeStruct((B, P, n_pad), cdt),
                   jax.ShapeDtypeStruct((B, C, n_pad), cdt)),
        grid_spec=pltpu.PrefetchScalarGridSpec(
            num_scalar_prefetch=0,
            grid=(B, n_pad // tn),
            in_specs=[
                pl.BlockSpec((1, C, tn), lambda b, i: (b, 0, i)),    # x
                const2((P, C)), const2((P, 1)),                      # wq, bq
                const2((P, C)), const2((P, 1)),                      # wk, bk
                const2((C, C)), const2((C, 1)),                      # wv, bv
            ],
            out_specs=[
                pl.BlockSpec((1, P, tn), lambda b, i: (b, 0, i)),    # Q
                pl.BlockSpec((1, P, tn), lambda b, i: (b, 0, i)),    # K
                pl.BlockSpec((1, C, tn), lambda b, i: (b, 0, i)),    # V
            ]),
        compiler_params=pltpu.CompilerParams(
            dimension_semantics=("parallel", "parallel"),
            vmem_limit_bytes=_vmem_limit(_proj_vmem_budget(C, P, tn, cdb, xdb))),
    )(x_flat, wq, bq, wk, bk, wv, bv)

    # ---- flash-attention pass ---------------------------------------------
    exp_dt = jnp.bfloat16 if cdt == jnp.dtype(jnp.bfloat16) else jnp.float32
    attn_kernel = functools.partial(
        _pam_attn_kernel, n_valid=N, needs_mask=(n_pad != N), exp_dtype=exp_dt)

    out_flat = pl.pallas_call(
        attn_kernel,
        out_shape=jax.ShapeDtypeStruct((B, C, n_pad), in_dt),
        grid_spec=pltpu.PrefetchScalarGridSpec(
            num_scalar_prefetch=0,
            grid=(B, n_pad // tq, n_pad // tk),
            in_specs=[
                pl.BlockSpec((1, P, tq), lambda b, qi, ki: (b, 0, qi)),  # Q (resident over ki)
                pl.BlockSpec((1, P, tk), lambda b, qi, ki: (b, 0, ki)),  # K stream
                pl.BlockSpec((1, C, tk), lambda b, qi, ki: (b, 0, ki)),  # V stream
                pl.BlockSpec((1, C, tq), lambda b, qi, ki: (b, 0, qi)),  # x (residual)
                pl.BlockSpec(memory_space=pltpu.MemorySpace.SMEM),       # gamma
            ],
            out_specs=pl.BlockSpec((1, C, tq), lambda b, qi, ki: (b, 0, qi)),
            scratch_shapes=[
                pltpu.VMEM((1, tq), f32),          # running max
                pltpu.VMEM((1, tq), f32),          # running softmax denominator
                pltpu.VMEM((C, tq), f32),          # output accumulator
            ]),
        compiler_params=pltpu.CompilerParams(
            dimension_semantics=("parallel", "parallel", "arbitrary"),
            vmem_limit_bytes=_vmem_limit(_attn_vmem_budget(C, P, tq, tk, cdb, xdb))),
    )(q_all, k_all, v_all, x_flat, gamma)

    if n_pad != N:
        out_flat = out_flat[:, :, :N]
    return out_flat.reshape(B, C, H, W, Z)


def init_params(key, in_dim):
    """Deterministic synthetic init matching PAM.__init__ shapes."""
    cq = in_dim // 8
    k1, k2, k3, k4, k5, k6 = jax.random.split(key, 6)
    scale = 1.0 / jnp.sqrt(jnp.float32(in_dim))
    return {
        "wq": jax.random.normal(k1, (cq, in_dim), jnp.float32) * scale,
        "bq": jax.random.normal(k2, (cq,), jnp.float32) * scale,
        "wk": jax.random.normal(k3, (cq, in_dim), jnp.float32) * scale,
        "bk": jax.random.normal(k4, (cq,), jnp.float32) * scale,
        "wv": jax.random.normal(k5, (in_dim, in_dim), jnp.float32) * scale,
        "bv": jax.random.normal(k6, (in_dim,), jnp.float32) * scale,
        "gamma": jnp.zeros((1,), jnp.float32),   # nn.Parameter(torch.zeros(1))
    }


def pam_reference(x, params):
    """Pure-JAX (f32) reference mirroring the PyTorch forward exactly."""
    B, C, H, W, Z = x.shape
    N = H * W * Z
    xf = x.astype(jnp.float32).reshape(B, C, N)
    proj_q = jnp.einsum("oc,bcn->bon", params["wq"], xf) + params["bq"][None, :, None]
    proj_k = jnp.einsum("oc,bcn->bon", params["wk"], xf) + params["bk"][None, :, None]
    proj_v = jnp.einsum("oc,bcn->bon", params["wv"], xf) + params["bv"][None, :, None]
    energy = jnp.einsum("bci,bcj->bij", proj_q, proj_k)      # (B, N, N)
    attn = jax.nn.softmax(energy, axis=-1)
    out = jnp.einsum("bcj,bij->bci", proj_v, attn).reshape(B, C, H, W, Z)
    return params["gamma"][0] * out + xf.reshape(B, C, H, W, Z)


if __name__ == "__main__":
    key = jax.random.PRNGKey(0)
    kx, kp = jax.random.split(key)

    B, C, H, W, Z = 2, 16, 8, 8, 8          # N = 512 -> single 512 query/key tile
    x = jax.random.normal(kx, (B, C, H, W, Z), jnp.float32)
    params = init_params(kp, C)
    # nonzero gamma so the attention path actually contributes to the check
    params = dict(params, gamma=jnp.array([0.5], jnp.float32))

    # f32 path: strict check.
    out = jax.block_until_ready(pam_forward(x, params))
    ref = pam_reference(x, params)
    assert out.shape == (B, C, H, W, Z)
    assert jnp.allclose(out, ref, atol=1e-4, rtol=1e-4), "f32 mismatch vs reference"

    # N = 125 (not a multiple of 128): exercises spatial padding + key masking.
    xo = jax.random.normal(kx, (B, C, 5, 5, 5), jnp.float32)
    outo = jax.block_until_ready(pam_forward(xo, params))
    refo = pam_reference(xo, params)
    assert outo.shape == (B, C, 5, 5, 5)
    assert jnp.allclose(outo, refo, atol=1e-4, rtol=1e-4), "masked-N mismatch"

    # bf16 path (bf16 MXU operands + bf16 softmax exp); loose tolerance.
    xb = x.astype(jnp.bfloat16)
    outb = jax.block_until_ready(pam_forward(xb, params))
    refb = pam_reference(xb, params)
    assert outb.shape == (B, C, H, W, Z)
    assert jnp.allclose(outb.astype(jnp.float32), refb, atol=1e-1, rtol=1e-1), \
        "bf16 mismatch vs reference"

    print("KERNEL_OK")
</pallas_src>

<mosaic_0001>
module attributes {stable_mosaic.version = 11 : i64} {
  func.func @_pam_proj_kernel(%arg0: i32, %arg1: i32, %arg2: memref<1x16x512xf32, #tpu.memory_space<vmem>>, %arg3: memref<8x16xf32, #tpu.memory_space<vmem>>, %arg4: memref<8x1xf32, #tpu.memory_space<vmem>>, %arg5: memref<8x16xf32, #tpu.memory_space<vmem>>, %arg6: memref<8x1xf32, #tpu.memory_space<vmem>>, %arg7: memref<16x16xf32, #tpu.memory_space<vmem>>, %arg8: memref<16x1xf32, #tpu.memory_space<vmem>>, %arg9: memref<1x8x512xf32, #tpu.memory_space<vmem>>, %arg10: memref<1x8x512xf32, #tpu.memory_space<vmem>>, %arg11: memref<1x16x512xf32, #tpu.memory_space<vmem>>) attributes {dimension_semantics = [#tpu.dimension_semantics<parallel>, #tpu.dimension_semantics<parallel>], iteration_bounds = array<i64: 2, 1>, scalar_prefetch = 0 : i64, scratch_operands = 0 : i64, tpu.core_type = #tpu.core_type<tc>, window_params = [{transform_indices = @transform_0, window_bounds = array<i64: 1, 16, 512>}, {pipeline_mode = #tpu.pipeline_mode<synchronous>, transform_indices = @transform_1, window_bounds = array<i64: 8, 16>}, {pipeline_mode = #tpu.pipeline_mode<synchronous>, transform_indices = @transform_2, window_bounds = array<i64: 8, 1>}, {pipeline_mode = #tpu.pipeline_mode<synchronous>, transform_indices = @transform_3, window_bounds = array<i64: 8, 16>}, {pipeline_mode = #tpu.pipeline_mode<synchronous>, transform_indices = @transform_4, window_bounds = array<i64: 8, 1>}, {pipeline_mode = #tpu.pipeline_mode<synchronous>, transform_indices = @transform_5, window_bounds = array<i64: 16, 16>}, {pipeline_mode = #tpu.pipeline_mode<synchronous>, transform_indices = @transform_6, window_bounds = array<i64: 16, 1>}, {transform_indices = @transform_7, window_bounds = array<i64: 1, 8, 512>}, {transform_indices = @transform_8, window_bounds = array<i64: 1, 8, 512>}, {transform_indices = @transform_9, window_bounds = array<i64: 1, 16, 512>}]} {
    %c0 = arith.constant 0 : index
    %c0_0 = arith.constant 0 : index
    %c0_1 = arith.constant 0 : index
    %0 = vector.load %arg2[%c0, %c0_0, %c0_1] : memref<1x16x512xf32, #tpu.memory_space<vmem>>, vector<1x16x512xf32>
    %1 = vector.shape_cast %0 : vector<1x16x512xf32> to vector<16x512xf32>
    %c0_2 = arith.constant 0 : index
    %c0_3 = arith.constant 0 : index
    %2 = vector.load %arg3[%c0_2, %c0_3] : memref<8x16xf32, #tpu.memory_space<vmem>>, vector<8x16xf32>
    %cst = arith.constant dense<0.000000e+00> : vector<8x512xf32>
    %3 = tpu.matmul %2, %1, %cst {dimension_numbers = #tpu.dot_dimension_numbers<[1], [0], [0], [1], [0, 0, 1, 1], [], []>} : vector<8x16xf32>, vector<16x512xf32>, vector<8x512xf32> -> vector<8x512xf32>
    %c0_4 = arith.constant 0 : index
    %c0_5 = arith.constant 0 : index
    %4 = vector.load %arg4[%c0_4, %c0_5] : memref<8x1xf32, #tpu.memory_space<vmem>>, vector<8x1xf32>
    %5 = vector.broadcast %4 : vector<8x1xf32> to vector<8x512xf32>
    %6 = arith.addf %3, %5 : vector<8x512xf32>
    %c0_6 = arith.constant 0 : index
    %c0_7 = arith.constant 0 : index
    %7 = vector.load %arg5[%c0_6, %c0_7] : memref<8x16xf32, #tpu.memory_space<vmem>>, vector<8x16xf32>
    %cst_8 = arith.constant dense<0.000000e+00> : vector<8x512xf32>
    %8 = tpu.matmul %7, %1, %cst_8 {dimension_numbers = #tpu.dot_dimension_numbers<[1], [0], [0], [1], [0, 0, 1, 1], [], []>} : vector<8x16xf32>, vector<16x512xf32>, vector<8x512xf32> -> vector<8x512xf32>
    %c0_9 = arith.constant 0 : index
    %c0_10 = arith.constant 0 : index
    %9 = vector.load %arg6[%c0_9, %c0_10] : memref<8x1xf32, #tpu.memory_space<vmem>>, vector<8x1xf32>
    %10 = vector.broadcast %9 : vector<8x1xf32> to vector<8x512xf32>
    %11 = arith.addf %8, %10 : vector<8x512xf32>
    %c0_11 = arith.constant 0 : index
    %c0_12 = arith.constant 0 : index
    %12 = vector.load %arg7[%c0_11, %c0_12] : memref<16x16xf32, #tpu.memory_space<vmem>>, vector<16x16xf32>
    %cst_13 = arith.constant dense<0.000000e+00> : vector<16x512xf32>
    %13 = tpu.matmul %12, %1, %cst_13 {dimension_numbers = #tpu.dot_dimension_numbers<[1], [0], [0], [1], [0, 0, 1, 1], [], []>} : vector<16x16xf32>, vector<16x512xf32>, vector<16x512xf32> -> vector<16x512xf32>
    %c0_14 = arith.constant 0 : index
    %c0_15 = arith.constant 0 : index
    %14 = vector.load %arg8[%c0_14, %c0_15] : memref<16x1xf32, #tpu.memory_space<vmem>>, vector<16x1xf32>
    %15 = vector.broadcast %14 : vector<16x1xf32> to vector<16x512xf32>
    %16 = arith.addf %13, %15 : vector<16x512xf32>
    %c0_16 = arith.constant 0 : index
    %c0_17 = arith.constant 0 : index
    %c0_18 = arith.constant 0 : index
    %17 = vector.load %arg9[%c0_16, %c0_17, %c0_18] : memref<1x8x512xf32, #tpu.memory_space<vmem>>, vector<1x8x512xf32>
    %18 = vector.shape_cast %17 : vector<1x8x512xf32> to vector<8x512xf32>
    %19 = vector.shape_cast %6 : vector<8x512xf32> to vector<1x8x512xf32>
    tpu.vector_store %arg9[%c0_16, %c0_17, %c0_18], %19 {strides = array<i32>} : memref<1x8x512xf32, #tpu.memory_space<vmem>>, vector<1x8x512xf32>,
    %c0_19 = arith.constant 0 : index
    %c0_20 = arith.constant 0 : index
    %c0_21 = arith.constant 0 : index
    %20 = vector.load %arg10[%c0_19, %c0_20, %c0_21] : memref<1x8x512xf32, #tpu.memory_space<vmem>>, vector<1x8x512xf32>
    %21 = vector.shape_cast %20 : vector<1x8x512xf32> to vector<8x512xf32>
    %22 = vector.shape_cast %11 : vector<8x512xf32> to vector<1x8x512xf32>
    tpu.vector_store %arg10[%c0_19, %c0_20, %c0_21], %22 {strides = array<i32>} : memref<1x8x512xf32, #tpu.memory_space<vmem>>, vector<1x8x512xf32>,
    %c0_22 = arith.constant 0 : index
    %c0_23 = arith.constant 0 : index
    %c0_24 = arith.constant 0 : index
    %23 = vector.load %arg11[%c0_22, %c0_23, %c0_24] : memref<1x16x512xf32, #tpu.memory_space<vmem>>, vector<1x16x512xf32>
    %24 = vector.shape_cast %23 : vector<1x16x512xf32> to vector<16x512xf32>
    %25 = vector.shape_cast %16 : vector<16x512xf32> to vector<1x16x512xf32>
    tpu.vector_store %arg11[%c0_22, %c0_23, %c0_24], %25 {strides = array<i32>} : memref<1x16x512xf32, #tpu.memory_space<vmem>>, vector<1x16x512xf32>,
    return
  }
  func.func @transform_0(%arg0: i32, %arg1: i32) -> (i32, i32, i32) {
    %c0_i32 = arith.constant 0 : i32
    %c0_i32_0 = arith.constant 0 : i32
    return %arg0, %c0_i32, %arg1 : i32, i32, i32
  }
  func.func @transform_1(%arg0: i32, %arg1: i32) -> (i32, i32) {
    %c0_i32 = arith.constant 0 : i32
    %c0_i32_0 = arith.constant 0 : i32
    %c0_i32_1 = arith.constant 0 : i32
    return %c0_i32, %c0_i32_0 : i32, i32
  }
  func.func @transform_2(%arg0: i32, %arg1: i32) -> (i32, i32) {
    %c0_i32 = arith.constant 0 : i32
    %c0_i32_0 = arith.constant 0 : i32
    %c0_i32_1 = arith.constant 0 : i32
    return %c0_i32, %c0_i32_0 : i32, i32
  }
  func.func @transform_3(%arg0: i32, %arg1: i32) -> (i32, i32) {
    %c0_i32 = arith.constant 0 : i32
    %c0_i32_0 = arith.constant 0 : i32
    %c0_i32_1 = arith.constant 0 : i32
    return %c0_i32, %c0_i32_0 : i32, i32
  }
  func.func @transform_4(%arg0: i32, %arg1: i32) -> (i32, i32) {
    %c0_i32 = arith.constant 0 : i32
    %c0_i32_0 = arith.constant 0 : i32
    %c0_i32_1 = arith.constant 0 : i32
    return %c0_i32, %c0_i32_0 : i32, i32
  }
  func.func @transform_5(%arg0: i32, %arg1: i32) -> (i32, i32) {
    %c0_i32 = arith.constant 0 : i32
    %c0_i32_0 = arith.constant 0 : i32
    %c0_i32_1 = arith.constant 0 : i32
    return %c0_i32, %c0_i32_0 : i32, i32
  }
  func.func @transform_6(%arg0: i32, %arg1: i32) -> (i32, i32) {
    %c0_i32 = arith.constant 0 : i32
    %c0_i32_0 = arith.constant 0 : i32
    %c0_i32_1 = arith.constant 0 : i32
    return %c0_i32, %c0_i32_0 : i32, i32
  }
  func.func @transform_7(%arg0: i32, %arg1: i32) -> (i32, i32, i32) {
    %c0_i32 = arith.constant 0 : i32
    %c0_i32_0 = arith.constant 0 : i32
    return %arg0, %c0_i32, %arg1 : i32, i32, i32
  }
  func.func @transform_8(%arg0: i32, %arg1: i32) -> (i32, i32, i32) {
    %c0_i32 = arith.constant 0 : i32
    %c0_i32_0 = arith.constant 0 : i32
    return %arg0, %c0_i32, %arg1 : i32, i32, i32
  }
  func.func @transform_9(%arg0: i32, %arg1: i32) -> (i32, i32, i32) {
    %c0_i32 = arith.constant 0 : i32
    %c0_i32_0 = arith.constant 0 : i32
    return %arg0, %c0_i32, %arg1 : i32, i32, i32
  }
}

</mosaic_0001>

<bundles_post_ra>
// kernel: tpu_custom_call.1
= control target key start
LH: loop header
LB: loop body
LE: loop exit
PB: predicated region body
PF: predicated region fallthrough
CT: control target
= control target key end

     0   :  { %s1784_s0 = inlined_call_operand.hbm [shape: f32[2,16,512], index: 0, kind: input, shape index: {}]   ;;  %s1785_s1 = inlined_call_operand.vmem [shape: f32[8,16], index: 1, kind: input, shape index: {}]   ;;  %s1786_s2 = inlined_call_operand.vmem [shape: f32[8,1], index: 2, kind: input, shape index: {}]   ;;  %s1787_s3 = inlined_call_operand.vmem [shape: f32[8,16], index: 3, kind: input, shape index: {}]   ;;  %s1788_s4 = inlined_call_operand.vmem [shape: f32[8,1], index: 4, kind: input, shape index: {}]   ;;  %s1789_s5 = inlined_call_operand.vmem [shape: f32[16,16], index: 5, kind: input, shape index: {}]   ;;  %s1790_s6 = inlined_call_operand.vmem [shape: f32[16,1], index: 6, kind: input, shape index: {}]   ;;  %s1791_s7 = inlined_call_operand.hbm [shape: f32[2,8,512], index: 7, kind: output, shape index: {0}]   ;;  %s1792_s8 = inlined_call_operand.hbm [shape: f32[2,8,512], index: 8, kind: output, shape index: {1}]   ;;  %s1793_s9 = inlined_call_operand.hbm [shape: f32[2,16,512], index: 9, kind: output, shape index: {2}]  }
   0x1   :  { %1800 = sst [smem:[#allocation14_spill]] %s1784_s0 }
   0x2   :  { %15 = vsyncpa [#allocation3], 0 }
   0x3   :  { %17 = vsyncpa [#allocation3 + $0x1], 0 }
   0x4   :  { %18 = vsyncpa [#allocation4], 0 }
   0x5   :  { %20 = vsyncpa [#allocation4 + $0x1], 0 }
   0x6   :  { %21 = vsyncpa [#allocation7], 0 }
   0x7   :  { %23 = vsyncpa [#allocation7 + $0x1], 0  ;;  %s1483_s30 = smov 0   ;;  %s1485_s10 = smov 0  }
   0x8   :  { %s1487_s11 = smov 0   ;;  %s1489_s12 = smov 0  }
   0x9   :  { %s1491_s13 = smov 0   ;;  %s1493_s14 = smov 0  }
   0xa LB: > { %1801 = sst [smem:[#allocation12_spill]] %s1417_s13  ;;  %s1514_s15 = sadd.s32 4294967295, %s1421_s14   ;;  %s1421_s14 = sphi %s1493_s14, %s29_s14   ;;  %s1417_s13 = sphi %s1491_s13, %s1819_s13   ;;  %s1413_s12 = sphi %s1489_s12, %s1818_s12   ;;  %s1409_s11 = sphi %s1487_s11, %s1822_s11   ;;  %s1405_s10 = sphi %s1485_s10, %s1821_s10   ;;  %s1401_s30 = sphi %s1483_s30, %s1820_s30  }
   0xb   : > { %s1794_s16 = sadd.s32 4294967294, %s1421_s14   ;;  %s41_s17 = sadd.s32 1, %s1417_s13 }
   0xc   : > { %s50_s18 = sadd.s32 1, %s1409_s11  ;;  %p43_p0 = scmp.ge.s32.totalorder %s41_s17, 2 }
   0xd   : > { %p57_p1 = scmp.ne.s32.totalorder %s1409_s11, %s1405_s10  ;;  %p58_p2 = scmp.eq.s32.totalorder %s1421_s14, 0 }
   0xe   : > { %p63_p3 = scmp.ne.s32.totalorder %s1405_s10, %s1401_s30  ;;  %s1824_s17 = smov (%p43_p0, %s41_s17), 0 }
   0xf   : > { %1802 = sst [smem:[#allocation13_spill]] %s1824_s17  ;;  %p1526_p4 = por %p58_p2, %p57_p1 }
  0x10   : > { %p64_p5 = scmp.eq.s32.totalorder %s1514_s15, 0  ;;  %s45_s20 = ssub.s32 %s1417_s13, %s1824_s17 }
  0x11   : > { %p215_p6 = scmp.eq.s32.totalorder %s1514_s15, 1  ;;  %p48_p7 = scmp.eq.s32.totalorder %s45_s20, 0 }
  0x12   : > { %p1534_p8 = por %p64_p5, %p63_p3  ;;  %p221_p10 = scmp.eq.s32.totalorder %s1794_s16, 1 }
  0x13   : > { %p1538_p9 = por %p215_p6, %p57_p1  ;;  %p1191_p13 = scmp.lt.s32.totalorder %s1421_s14, 2 }
  0x14   : > { %s1545_s23 = scalar_select %p48_p7, %s1409_s11, %s50_s18  }
  0x15   : > { %s1805_s22 = scalar_select %p1538_p9, 1, 0 }
  0x16   : > { %p1547_p11 = por %p221_p10, %p63_p3  ;;  %s315_s25 = sand.u32 1, %s1409_s11  }
  0x17   : > { %s1114_s26 = sshll.u32 %s315_s25, 6  ;;  %s1141_s27 = sshll.u32 %s1417_s13, 10 }
  0x18   : > { %s1806_s24 = scalar_select %p1547_p11, 1, 0 }
  0x19   : > { %s1807_s0 = sld [smem:[#allocation14_spill]]  ;;  %s319_s18 = scalar_lea.vmem [#allocation2], %s1114_s26 }
  0x1a   : > { %s328_s16 = sshll.u32 %s319_s18, 4  ;;  %p1564_p0 = pnand %p1191_p13, %p1526_p4  ;;  %s1560_s16 = int_to_ptr.vmem [resolvable:$true] %s328_s16 }
  0x1b   : > { %s1569_s13 = scalar_lea.sflag [#allocation3], %s315_s25 }
  0x1c   : > { %p1251_p3 = pneg %p1564_p0 }
  0x1f   : > { %s1558_s20 = scalar_lea.hbm %s1807_s0, %s1141_s27  ;;  %s1254_s19 = scalar_lea.hbm %s1807_s0, 2048 }
  0x20   : > { %s1249_s27 = scalar_lea.hbm %s1558_s20, 1024  ;;  %p1255_p4 = scmp.lt.u32.totalorder %s1558_s20, %s1807_s0 }
  0x21   : > { %p1250_p2 = scmp.ne.s32.totalorder %s1558_s20, %s1249_s27  ;;  %p1256_p7 = scmp.lt.u32.totalorder %s1254_s19, %s1249_s27 }
  0x22   : > { %p1258_p13 = scmp.lt.u32.totalorder %s1249_s27, %s1558_s20 }
  0x23   : > { %p1252_p5 = pnand %p1251_p3, %p1250_p2  ;;  %p1257_p10 = por %p1256_p7, %p1255_p4 }
  0x25   : > { %p1253_p6 = pneg %p1252_p5  ;;  %p1259_p12 = por %p1258_p13, %p1257_p10 }
  0x27   : > { %p1260_p1 = pnand %p1259_p12, %p1253_p6 }
  0x29   : > { %1263 = shalt.err (!%p1260_p1)
}
  0x2a   : > { %s1264_s25 = scalar_lea.vmem %s1560_s16, 1024  ;;  %s1423_s26 = smov [#allocation2]  }
  0x2b   : > { %p1265_p2 = scmp.ne.s32.totalorder %s1560_s16, %s1264_s25  ;;  %s1269_s28 = sshll.u32 %s1423_s26, 4  ;;  %s1270_s28 = int_to_ptr.vmem [resolvable:$false] %s1269_s28 }
  0x2c   : > { %s1271_s29 = scalar_lea.vmem %s1270_s28, 2048  ;;  %p1272_p9 = scmp.lt.s32.totalorder %s1560_s16, %s1270_s28 }
  0x2d   : > { %p1267_p5 = pnand %p1265_p2, %p1251_p3  ;;  %p1273_p4 = scmp.lt.s32.totalorder %s1271_s29, %s1264_s25 }
  0x2f   : > { %p1268_p11 = pneg %p1267_p5  ;;  %p1274_p7 = por %p1273_p4, %p1272_p9 }
  0x31   : > { %p1275_p10 = pnand %p1274_p7, %p1268_p11 }
  0x33   : > { %1278 = shalt.err (!%p1275_p10)
}
  0x34   : > { %s1424_s27 = smov 512   ;;  %s1425_s19 = smov 32  }
  0x35   : > { %1180 = dma.hbm_to_vmem [thread:$0]  (!%p1564_p0), %s1558_s20, 1024, %s1560_s16, %s1569_s13, %s1424_s27, %s1424_s27, %s1425_s19  }
  0x36   : > { %p336_p12 = scmp.lt.s32.totalorder %s1421_s14, 3  ;;  %p1809_p1 = scmp.ge.s32.totalorder %s1421_s14, 1 }
  0x38   : > { %p337_p3 = pnand %p1809_p1, %p336_p12 }
  0x39   : > { %s1601_s18 = sand.u32 (!%p337_p3), 1, %s1405_s10  }
  0x3a   : > { %340 = sbr.rel (%p337_p3) target bundleno = 356 (0x164), region = 48  ;;  %s1798_s25 = sshll.u32 (!%p337_p3), %s1601_s18, 6 }
  0x3b   : > { %s343_s26 = scalar_lea.sflag (!%p337_p3), [#allocation3], %s1601_s18  ;;  %s346_s28 = scalar_lea.vmem (!%p337_p3), [#allocation2], %s1798_s25 }
  0x41   : > { %1388 = dma.done.wait (%p1534_p8), %s343_s26, 1024  }
  0x42   : > { %1390 = vsyncadd (%p1534_p8), %s343_s26, 4294966272  ;;  %v1426_v0 = vmov 0.0   ;;  %v1427_v1 = vmov 0   ;;  %v396_v2 = vld [vmem:[%s346_s28 + $0x8] sm:$0xff]  ;;  %v398_v4 = vld [vmem:[%s346_s28 + $0x18] sm:$0xff]  ;;  %vm410_vm0 = vcmask 130048  }
  0x43   : > { %478 = vmatprep.mubr.f32.mxu0 %v1426_v0  ;;  %549 = vmatprep.mubr.f32.mxu1 %v1426_v0  ;;  %v400_v3 = vld [vmem:[%s346_s28 + $0x28] sm:$0xff]  ;;  %v402_v6 = vld [vmem:[%s346_s28 + $0x38] sm:$0xff]  ;;  %v395_v7 = vld [vmem:[%s346_s28] sm:$0xff]  ;;  %s1119_s27 = sshll.u32 %s1601_s18, 5  ;;  %s1799_s19 = sshll.u32 %s1413_s12, 9 }
  0x44   : > { %1247 = vset.pattern.permute.xlu0 %v1427_v1  ;;  %1248 = vset.pattern.permute.xlu1 %v1427_v1  ;;  %v1145_v5 = vpack.c.bf16 %v400_v3, %v396_v2  ;;  %v399_v8 = vld [vmem:[%s346_s28 + $0x20] sm:$0xff]  ;;  %v1149_v9 = vpack.c.bf16 %v402_v6, %v398_v4  ;;  %v397_v11 = vld [vmem:[%s346_s28 + $0x10] sm:$0xff]  ;;  %v711_v20 = vld [vmem:[%s1790_s6 + $0x8] sm:$0xff]  ;;  %s376_s26 = scalar_lea.vmem [#allocation5], %s1119_s27  ;;  %s1651_s21 = scalar_lea.hbm %s1791_s7, %s1799_s19 }
  0x45   : > { %v1147_v10 = vpack.c.bf16 %v399_v8, %v395_v7  ;;  %v401_v12 = vld [vmem:[%s346_s28 + $0x30] sm:$0xff]  ;;  %v403_v14 = vld [vmem:[%s1785_s1] sm:$0xff]  ;;  %v709_v21 = vld [vmem:[%s1789_s5 + $0x8] sm:$0xff]  ;;  %s925_s28 = sshll.u32 %s376_s26, 4  ;;  %s1655_s20 = scalar_lea.vmem [#allocation6], %s1119_s27  ;;  %s1653_s28 = int_to_ptr.vmem [resolvable:$true] %s925_s28 }
  0x46   : > { %1146 = vmatprep.subr.bf16.mxu0 %v1145_v5  ;;  %v1151_v13 = vpack.c.bf16 %v401_v12, %v397_v11  ;;  %1150 = vmatprep.subr.bf16.mxu1 %v1149_v9  ;;  %v557_v15 = vld [vmem:[%s1788_s4] sm:$0xff]  ;;  %s899_s16 = scalar_lea.sflag [#allocation4], %s1601_s18  ;;  %s1279_s17 = scalar_lea.vmem %s1653_s28, 512 }
  0x47   : > { %1148 = vmatpush1.bf16.msra.mxu0 %v1147_v10  ;;  %v710_v16 = vld [vmem:[%s1790_s6] sm:$0xff]  ;;  %560 = vperm.xlu0 %1247, %v557_v15   ;;  %p1280_p8 = scmp.ne.s32.totalorder %s1653_s28, %s1279_s17  ;;  %p1810_p9 = scmp.ne.s32.totalorder %s1805_s22, 0 }
  0x48   : > { %1152 = vmatpush1.bf16.msra.mxu1 %v1151_v13  ;;  %1154 = vmatprep.subr.bf16.mxu0 %v1145_v5  ;;  %v556_v17 = vld [vmem:[%s1787_s3] sm:$0xff]  ;;  %s1428_s27 = smov [#allocation5]  }
  0x49   : > { %1158 = vmatprep.subr.bf16.mxu1 %v1149_v9  ;;  %714 = vperm.xlu1 %1248, %v710_v16   ;;  %v404_v18 = vld [vmem:[%s1786_s2] sm:$0xff]  ;;  %p1281_p11 = pnand %p1280_p8, %p1810_p9  ;;  %s1283_s25 = sshll.u32 %s1428_s27, 4  ;;  %s1284_s25 = int_to_ptr.vmem [resolvable:$false] %s1283_s25 }
  0x4a   : > { %1122 = vmatmul.mubr.msk.f32.vlgmr.msra.gmra.mrb[0].mxu0 %vm410_vm0, %v403_v14  ;;  %v708_v19 = vld [vmem:[%s1789_s5] sm:$0xff]  ;;  %s1285_s13 = scalar_lea.vmem %s1284_s25, 1024  ;;  %p1286_p6 = scmp.lt.s32.totalorder %s1653_s28, %s1284_s25 }
  0x4b   : > { %1123 = vmatmul.mubr.msk.f32.vlgmr.msra.gmra.mrb[0].mxu1 %vm410_vm0, %v403_v14  ;;  %1156 = vmatpush1.bf16.msra.mxu0 %v1147_v10  ;;  %p1282_p0 = pneg %p1281_p11  ;;  %p1287_p13 = scmp.lt.s32.totalorder %s1285_s13, %s1279_s17 }
  0x4c   : > { %1160 = vmatpush1.bf16.msra.mxu1 %v1151_v13  ;;  %630 = vmatprep.mubr.f32.mxu0 %v1426_v0 }
  0x4d   : > { %701 = vmatprep.mubr.f32.mxu1 %v1426_v0  ;;  %1162 = vmatprep.subr.bf16.mxu0 %v1145_v5  ;;  %p1288_p2 = por %p1287_p13, %p1286_p6 }
  0x4e   : > { %1124 = vmatmul.mubr.msk.f32.vlgmr.msra.gmra.mrb[2].mxu0 %vm410_vm0, %v556_v17  ;;  %1166 = vmatprep.subr.bf16.mxu1 %v1149_v9 }
  0x4f   : > { %1125 = vmatmul.mubr.msk.f32.vlgmr.msra.gmra.mrb[2].mxu1 %vm410_vm0, %v556_v17  ;;  %1164 = vmatpush1.bf16.msra.mxu0 %v1147_v10  ;;  %p1289_p5 = pnand %p1288_p2, %p1282_p0 }
  0x50   : > { %1168 = vmatpush1.bf16.msra.mxu1 %v1151_v13  ;;  %792 = vmatprep.mubr.f32.mxu0 %v1426_v0 }
  0x51   : > { %869 = vmatprep.mubr.f32.mxu1 %v1426_v0  ;;  %407 = vperm.xlu0 %1247, %v404_v18  }
  0x52   : > { %1126 = vmatmul.mubr.msk.f32.vlgmr.msra.gmra.mrb[4].mxu0 %vm410_vm0, %v708_v19  ;;  %719 = vperm.xlu1 %1248, %v711_v20  }
  0x53   : > { %1128 = vmatmul.mubr.msk.f32.vlgmr.msra.gmra.mrb[4].mxu1 %vm410_vm0, %v708_v19  ;;  %798 = vmatprep.mubr.f32.mxu0 %v1426_v0 }
  0x54   : > { %875 = vmatprep.mubr.f32.mxu1 %v1426_v0 }
  0x56   : > { %1127 = vmatmul.mubr.msk.f32.gmra.mrb[6].mxu0 %vm410_vm0, %v709_v21 }
  0x57   : > { %1129 = vmatmul.mubr.msk.f32.gmra.mrb[6].mxu1 %vm410_vm0, %v709_v21 }
  0xc6   : > { %v561_v22 = vpop.permute.xlu0 %560 }
  0xc8   : > { %v1658_v39 = vpop.permute.xlu1 %714 }
  0xd0   : > { %v408_v23 = vpop.permute.xlu0 %407 }
 0x11d   : > { %v480_v24 = vpop.f32.mrb[0].mxu0 }
 0x11e   : > { %v551_v25 = vpop.f32.mrb[0].mxu1  ;;  %v481_v26 = vadd.f32 %v480_v24, %v408_v23  ;;  %v482_v27 = vpop.f32.mrb[1].mxu0 }
 0x11f   : > { %v552_v28 = vadd.f32 %v551_v25, %v408_v23  ;;  %v483_v29 = vadd.f32 %v482_v27, %v408_v23  ;;  %v553_v30 = vpop.f32.mrb[1].mxu1 }
 0x120   : > { %882 = vst [vmem:[%s376_s26] sm:$0xff] %v481_v26  ;;  %v554_v31 = vadd.f32 %v553_v30, %v408_v23 }
 0x121   : > { %884 = vst [vmem:[%s376_s26 + $0x10] sm:$0xff] %v552_v28  ;;  %883 = vst [vmem:[%s376_s26 + $0x8] sm:$0xff] %v483_v29  ;;  %v632_v32 = vpop.f32.mrb[2].mxu0 }
 0x122   : > { %885 = vst [vmem:[%s376_s26 + $0x18] sm:$0xff] %v554_v31  ;;  %v633_v33 = vadd.f32 %v632_v32, %v561_v22  ;;  %v703_v34 = vpop.f32.mrb[2].mxu1  ;;  %v634_v35 = vpop.f32.mrb[3].mxu0 }
 0x123   : > { %v704_v36 = vadd.f32 %v703_v34, %v561_v22  ;;  %v635_v37 = vadd.f32 %v634_v35, %v561_v22  ;;  %v705_v38 = vpop.f32.mrb[3].mxu1 }
 0x124   : > { %1292 = shalt.err (!%p1289_p5)
}
 0x125   : > { %s1293_s26 = scalar_lea.hbm %s1651_s21, 512  ;;  %s1297_s27 = scalar_lea.hbm %s1791_s7, 1024 }
 0x126   : > { %p1294_p4 = scmp.ne.s32.totalorder %s1651_s21, %s1293_s26  ;;  %p1298_p12 = scmp.lt.u32.totalorder %s1651_s21, %s1791_s7 }
 0x127   : > { %p1299_p1 = scmp.lt.u32.totalorder %s1297_s27, %s1293_s26  ;;  %p1301_p8 = scmp.lt.u32.totalorder %s1293_s26, %s1651_s21 }
 0x128   : > { %p1295_p7 = pnand %p1294_p4, %p1810_p9 }
 0x129   : > { %p1300_p3 = por %p1299_p1, %p1298_p12 }
 0x12a   : > { %p1296_p10 = pneg %p1295_p7 }
 0x12b   : > { %p1302_p11 = por %p1301_p8, %p1300_p3 }
 0x12d   : > { %p1303_p0 = pnand %p1302_p11, %p1296_p10 }
 0x12f   : > { %1306 = shalt.err (!%p1303_p0)
}
 0x130   : > { %1171 = dma.vmem_to_hbm [thread:$0]  (%p1810_p9), %s1653_s28, 512, %s1651_s21, %s899_s16   ;;  %886 = vst [vmem:[%s1655_s20] sm:$0xff] %v633_v33  ;;  %v706_v40 = vadd.f32 %v705_v38, %v561_v22  ;;  %888 = vst [vmem:[%s1655_s20 + $0x10] sm:$0xff] %v704_v36  ;;  %v794_v41 = vpop.f32.mrb[4].mxu0  ;;  %v871_v43 = vpop.f32.mrb[4].mxu1 }
 0x131   : > { %s1811_s0 = sshll.u32 %s1413_s12, 9  ;;  %s1812_s17 = sshll.u32 %s1655_s20, 4  ;;  %887 = vst [vmem:[%s1655_s20 + $0x8] sm:$0xff] %v635_v37  ;;  %v795_v42 = vadd.f32 %v794_v41, %v1658_v39  ;;  %v796_v44 = vpop.f32.mrb[5].mxu0  ;;  %v872_v45 = vadd.f32 %v871_v43, %v1658_v39  ;;  %v873_v47 = vpop.f32.mrb[5].mxu1  ;;  %s1692_s17 = int_to_ptr.vmem [resolvable:$true] %s1812_s17 }
 0x132   : > { %s1688_s29 = scalar_lea.hbm %s1792_s8, %s1811_s0  ;;  %889 = vst [vmem:[%s1655_s20 + $0x18] sm:$0xff] %v706_v40  ;;  %v797_v46 = vadd.f32 %v796_v44, %v1658_v39  ;;  %s1813_s28 = sand.u32 1, %s1514_s15  }
 0x133   : > { %s1702_s21 = scalar_lea.sflag [#allocation7], %s1813_s28  ;;  %s1307_s16 = scalar_lea.vmem %s1692_s17, 512 }
 0x134   : > { %p1308_p6 = scmp.ne.s32.totalorder %s1692_s17, %s1307_s16  ;;  %s1429_s26 = smov [#allocation6]  }
 0x135   : > { %s1311_s20 = sshll.u32 %s1429_s26, 4  ;;  %s1312_s20 = int_to_ptr.vmem [resolvable:$false] %s1311_s20 }
 0x136   : > { %p1309_p13 = pnand %p1308_p6, %p1810_p9  ;;  %s1313_s27 = scalar_lea.vmem %s1312_s20, 1024 }
 0x137   : > { %p1314_p5 = scmp.lt.s32.totalorder %s1692_s17, %s1312_s20  ;;  %p1315_p4 = scmp.lt.s32.totalorder %s1313_s27, %s1307_s16 }
 0x138   : > { %p1310_p2 = pneg %p1309_p13 }
 0x139   : > { %p1316_p7 = por %p1315_p4, %p1314_p5 }
 0x13b   : > { %p1317_p10 = pnand %p1316_p7, %p1310_p2 }
 0x13d   : > { %1320 = shalt.err (!%p1317_p10)
}
 0x13e   : > { %s1321_s15 = scalar_lea.hbm %s1688_s29, 512  ;;  %s1325_s19 = scalar_lea.hbm %s1792_s8, 1024 }
 0x13f   : > { %p1322_p12 = scmp.ne.s32.totalorder %s1688_s29, %s1321_s15  ;;  %p1326_p8 = scmp.lt.u32.totalorder %s1688_s29, %s1792_s8 }
 0x140   : > { %p1327_p11 = scmp.lt.u32.totalorder %s1325_s19, %s1321_s15  ;;  %p1329_p6 = scmp.lt.u32.totalorder %s1321_s15, %s1688_s29 }
 0x141   : > { %p1323_p1 = pnand %p1322_p12, %p1810_p9 }
 0x142   : > { %p1328_p0 = por %p1327_p11, %p1326_p8 }
 0x143   : > { %p1324_p3 = pneg %p1323_p1 }
 0x144   : > { %p1330_p13 = por %p1329_p6, %p1328_p0 }
 0x146   : > { %p1331_p2 = pnand %p1330_p13, %p1324_p3 }
 0x148   : > { %1334 = shalt.err (!%p1331_p2)
}
 0x149   : > { %1172 = dma.vmem_to_hbm [thread:$0]  (%p1810_p9), %s1692_s17, 512, %s1688_s29, %s1702_s21   ;;  %v874_v48 = vadd.f32 %v873_v47, %v1658_v39  ;;  %v720_v49 = vpop.permute.xlu1 %719  ;;  %v800_v50 = vpop.f32.mrb[6].mxu0 }
 0x14a   : > { %s1814_s16 = sshll.u32 %s1601_s18, 6  ;;  %s1144_s27 = sshll.u32 %s1413_s12, 10  ;;  %v801_v51 = vadd.f32 %v800_v50, %v720_v49  ;;  %v877_v52 = vpop.f32.mrb[6].mxu1  ;;  %v802_v53 = vpop.f32.mrb[7].mxu0 }
 0x14b   : > { %s390_s26 = scalar_lea.vmem [#allocation8], %s1814_s16  ;;  %v878_v54 = vadd.f32 %v877_v52, %v720_v49  ;;  %v803_v55 = vadd.f32 %v802_v53, %v720_v49  ;;  %v879_v56 = vpop.f32.mrb[7].mxu1  ;;  %s1735_s12 = scalar_lea.hbm %s1793_s9, %s1144_s27 }
 0x14c   : > { %890 = vst [vmem:[%s390_s26] sm:$0xff] %v795_v42  ;;  %s956_s20 = sshll.u32 %s390_s26, 4  ;;  %892 = vst [vmem:[%s390_s26 + $0x10] sm:$0xff] %v872_v45  ;;  %v880_v57 = vadd.f32 %v879_v56, %v720_v49  ;;  %s1430_s15 = smov [#allocation8]   ;;  %s1730_s20 = int_to_ptr.vmem [resolvable:$true] %s956_s20 }
 0x14d   : > { %891 = vst [vmem:[%s390_s26 + $0x8] sm:$0xff] %v797_v46  ;;  %893 = vst [vmem:[%s390_s26 + $0x18] sm:$0xff] %v874_v48  ;;  %s1335_s17 = scalar_lea.vmem %s1730_s20, 1024  ;;  %s1339_s25 = sshll.u32 %s1430_s15, 4  ;;  %s1340_s25 = int_to_ptr.vmem [resolvable:$false] %s1339_s25 }
 0x14e   : > { %894 = vst [vmem:[%s390_s26 + $0x20] sm:$0xff] %v801_v51  ;;  %896 = vst [vmem:[%s390_s26 + $0x30] sm:$0xff] %v878_v54  ;;  %p1336_p5 = scmp.ne.s32.totalorder %s1730_s20, %s1335_s17  ;;  %s1341_s0 = scalar_lea.vmem %s1340_s25, 2048 }
 0x14f   : > { %895 = vst [vmem:[%s390_s26 + $0x28] sm:$0xff] %v803_v55  ;;  %897 = vst [vmem:[%s390_s26 + $0x38] sm:$0xff] %v880_v57  ;;  %p1342_p10 = scmp.lt.s32.totalorder %s1730_s20, %s1340_s25  ;;  %p1343_p12 = scmp.lt.s32.totalorder %s1341_s0, %s1335_s17 }
 0x150   : > { %p1337_p4 = pnand %p1336_p5, %p1810_p9 }
 0x151   : > { %p1344_p1 = por %p1343_p12, %p1342_p10 }
 0x152   : > { %p1338_p7 = pneg %p1337_p4 }
 0x154   : > { %p1345_p3 = pnand %p1344_p1, %p1338_p7 }
 0x156   : > { %1348 = shalt.err (!%p1345_p3)
}
 0x157   : > { %s1349_s19 = scalar_lea.hbm %s1735_s12, 1024  ;;  %s1353_s16 = scalar_lea.hbm %s1793_s9, 2048 }
 0x158   : > { %p1350_p8 = scmp.ne.s32.totalorder %s1735_s12, %s1349_s19  ;;  %p1354_p6 = scmp.lt.u32.totalorder %s1735_s12, %s1793_s9 }
 0x159   : > { %p1355_p13 = scmp.lt.u32.totalorder %s1353_s16, %s1349_s19  ;;  %p1357_p5 = scmp.lt.u32.totalorder %s1349_s19, %s1735_s12 }
 0x15a   : > { %p1351_p11 = pnand %p1350_p8, %p1810_p9 }
 0x15b   : > { %p1356_p2 = por %p1355_p13, %p1354_p6 }
 0x15c   : > { %p1352_p0 = pneg %p1351_p11 }
 0x15d   : > { %p1358_p4 = por %p1357_p5, %p1356_p2 }
 0x15f   : > { %p1359_p7 = pnand %p1358_p4, %p1352_p0 }
 0x161   : > { %1362 = shalt.err (!%p1359_p7)
}
 0x162   : > { %s1431_s18 = smov 512   ;;  %s1432_s29 = smov 32  }
 0x163   : > { %1173 = dma.vmem_to_hbm [thread:$0]  (%p1810_p9), %s1730_s20, 1024, %s1735_s12, %s1702_s21, %s1431_s18, %s1431_s18, %s1432_s29  }
 0x164 PF: > { %s971_s17 = sand.u32 1, %s1401_s30   ;;  %p1815_p10 = scmp.ne.s32.totalorder %s1806_s24, 0 }
 0x165   : > { %p1816_p12 = scmp.ge.s32.totalorder %s1421_s14, 2  ;;  %s972_s15 = scalar_lea.sflag [#allocation4], %s971_s17 }
 0x167   : > { %p1182_p1 = pnand %p1816_p12, %p1815_p10 }
 0x169   : > { %1392 = dma.done.wait (!%p1182_p1), %s972_s15, 512  }
 0x16a   : > { %1394 = vsyncadd (!%p1182_p1), %s972_s15, 4294966784  ;;  %s1817_s25 = sadd.s32 4294967294, %s1421_s14  }
 0x16b   : > { %s980_s0 = sand.u32 1, %s1817_s25  }
 0x16c   : > { %s981_s19 = scalar_lea.sflag [#allocation7], %s980_s0 }
 0x16d   : > { %1396 = dma.done.wait (!%p1182_p1), %s981_s19, 1536  }
 0x16e   : > { %1398 = vsyncadd (!%p1182_p1), %s981_s19, 4294965760  ;;  %s29_s14 = sadd.s32 1, %s1421_s14   ;;  %s1818_s12 = sld [smem:[#allocation12_spill]] }
 0x16f   : > { %p26_p9 = scmp.ge.s32.totalorder %s29_s14, 4   ;;  %s1819_s13 = sld [smem:[#allocation13_spill]] }
 0x170   : > { %s1820_s30 = smov %s1405_s10  ;;  %s1821_s10 = smov %s1409_s11 }
 0x171   : > { %s1822_s11 = smov %s1545_s23  ;;  %28 = sbr.rel (!%p26_p9) target bundleno = 10 (0xa), region = 125 }
 0x178   :  { %995 = vsyncpa [#allocation3], 1 }
 0x179   :  { %997 = vsyncpa [#allocation3 + $0x1], 1 }
 0x17a   :  { %998 = vsyncpa [#allocation4], 1 }
 0x17b   :  { %1000 = vsyncpa [#allocation4 + $0x1], 1 }
 0x17c   :  { %1001 = vsyncpa [#allocation7], 1 }
 0x17d   :  { %1003 = vsyncpa [#allocation7 + $0x1], 1 }

</bundles_post_ra>
